<compile_context>
chip_gen: v6e
topology: v6e:2x2x1
jax: 0.10.0
libtpu: 0.0.40
codegen_flags: <defaults>
</compile_context>

<pallas_src>
import functools

import jax
import jax.numpy as jnp
from jax.experimental import pallas as pl
from jax.experimental.pallas import tpu as pltpu


def _mha_kernel(num_heads, d_k, BB, S, H, compute_dtype,
                q_ref, k_ref, v_ref, bias_ref,
                wqkv_ref, bqkv_ref, wo_ref, bo_ref, out_ref):
    """One grid step processes a block of BB batch elements, all heads.

    q_ref/k_ref/v_ref : (BB, S, H)
    bias_ref          : (BB, num_heads, S, S)   native torch layout
    wqkv_ref          : (3, H, num_heads*d_k)   q|k|v projection weights
    bqkv_ref          : (3, 1, num_heads*d_k)   q|k|v projection biases (f32)
    wo_ref            : (num_heads*d_k, H)      output projection weight
    bo_ref            : (1, H)                  output projection bias (f32)
    out_ref           : (BB, S, H)
    """
    nh = num_heads
    D = nh * d_k
    N = BB * S

    # Fat Q/K/V projections: (N, H) @ (H, nh*d_k).  The softmax scale is
    # already folded into the Q weight/bias wrapper-side.  f32 accumulate.
    def project(x_ref, idx):
        x = x_ref[...].reshape(N, H).astype(compute_dtype)
        w = wqkv_ref[idx]                       # (H, D)  compute_dtype
        b = bqkv_ref[idx]                       # (1, D)  f32
        return jnp.dot(x, w, preferred_element_type=jnp.float32) + b

    q2 = project(q_ref, 0)                      # (N, D) f32
    k2 = project(k_ref, 1)
    v2 = project(v_ref, 2)

    bias = bias_ref[...]                        # (BB, nh, S, S) f32

    ctx_parts = []
    for h in range(nh):                         # static unroll over heads
        sl = slice(h * d_k, (h + 1) * d_k)      # static lane slice
        qh = q2[:, sl].astype(compute_dtype).reshape(BB, S, d_k)
        kh = k2[:, sl].astype(compute_dtype).reshape(BB, S, d_k)
        vh = v2[:, sl].astype(compute_dtype).reshape(BB, S, d_k)

        scores = jnp.einsum("bqd,bkd->bqk", qh, kh,
                            preferred_element_type=jnp.float32)
        scores = scores + bias[:, h]            # (BB, S, S) f32

        m = jnp.max(scores, axis=-1, keepdims=True)
        # Fully -inf-masked rows: torch softmax -> NaN -> where(isnan, 0).
        # Sanitize the max so those rows give e == 0, s == 0, attn == 0.
        m = jnp.where(jnp.isfinite(m), m, 0.0)
        e = jnp.exp(scores - m)
        s = jnp.sum(e, axis=-1, keepdims=True)
        s_safe = jnp.where(s == 0.0, 1.0, s)
        attn = e * pl.reciprocal(s_safe, approx=False)   # EUP, not VALU divide
        # att_dropout: identity (eval mode).

        ctx_parts.append(
            jnp.einsum("bqk,bkd->bqd", attn.astype(compute_dtype), vh,
                       preferred_element_type=jnp.float32))   # (BB, S, d_k) f32

    # Head-major lane concat -> (N, nh*d_k); single fused output projection
    # with contraction K = nh*d_k (replaces nh narrow matmuls + head-sum).
    ctx = jnp.concatenate(ctx_parts, axis=-1).reshape(N, D)
    out = jnp.dot(ctx.astype(compute_dtype), wo_ref[...],
                  preferred_element_type=jnp.float32) + bo_ref[...]

    out_ref[...] = out.reshape(BB, S, H).astype(out_ref.dtype)


def pack_mha_params(params, num_heads, compute_dtype=jnp.bfloat16):
    """One-time packing of torch-layout Linear params into the kernel layout."""
    wq, bq, wk, bk, wv, bv, wo, bo = params
    D, H = wq.shape                              # torch Linear: (out, in)
    assert D % num_heads == 0
    d_k = D // num_heads
    scale = d_k ** (-0.5)

    # torch Linear: y = x @ W.T + b ; fold the softmax scale into the Q proj.
    w_qkv = jnp.stack([wq.T * scale, wk.T, wv.T], axis=0).astype(compute_dtype)
    b_qkv = jnp.stack([bq * scale, bk, bv], axis=0)[:, None, :].astype(jnp.float32)
    wo_p = wo.T.astype(compute_dtype)            # (D, H)
    bo_p = bo[None, :].astype(jnp.float32)       # (1, H)
    return w_qkv, b_qkv, wo_p, bo_p


def multi_head_attention(q, k, v, attn_bias, packed_params, num_heads,
                         *, batch_block=None):
    """q, k, v: [B, S, H]; attn_bias: [B, num_heads, S, S] (native layout)."""
    B, S, H = q.shape
    assert H % num_heads == 0
    d_k = H // num_heads
    D = num_heads * d_k
    w_qkv, b_qkv, wo_p, bo_p = packed_params
    compute_dtype = w_qkv.dtype

    if batch_block is None:
        # >= 2 grid steps by default: shards the "parallel" axis across
        # v7x's two TensorCores and pipelines block DMAs with compute.
        BB = B // 2 if (B % 2 == 0 and B >= 2) else B
    else:
        BB = batch_block
    assert B % BB == 0

    kernel = functools.partial(_mha_kernel, num_heads, d_k, BB, S, H,
                               compute_dtype)

    # Scoped-VMEM budget: double-buffered I/O blocks + weights + live
    # intermediates, with headroom; capped at 64 MiB so it is valid on v7x.
    f32 = 4
    io_blocks = 2 * (3 * BB * S * H + num_heads * BB * S * S + BB * S * H) * f32
    weights = (3 * H * D + 3 * D + D * H + H) * f32
    live = (3 * BB * S * D + 6 * BB * S * S + 2 * BB * S * D + BB * S * H) * f32
    vmem_limit = int(min(max(32 << 20, 2 * (io_blocks + weights + live)),
                         64 << 20))

    return pl.pallas_call(
        kernel,
        out_shape=jax.ShapeDtypeStruct((B, S, H), q.dtype),
        grid=(B // BB,),
        in_specs=[
            pl.BlockSpec((BB, S, H), lambda i: (i, 0, 0)),                 # q
            pl.BlockSpec((BB, S, H), lambda i: (i, 0, 0)),                 # k
            pl.BlockSpec((BB, S, H), lambda i: (i, 0, 0)),                 # v
            pl.BlockSpec((BB, num_heads, S, S), lambda i: (i, 0, 0, 0)),   # bias
            pl.BlockSpec((3, H, D), lambda i: (0, 0, 0)),                  # w_qkv
            pl.BlockSpec((3, 1, D), lambda i: (0, 0, 0)),                  # b_qkv
            pl.BlockSpec((D, H), lambda i: (0, 0)),                        # wo
            pl.BlockSpec((1, H), lambda i: (0, 0)),                        # bo
        ],
        out_specs=pl.BlockSpec((BB, S, H), lambda i: (i, 0, 0)),
        compiler_params=pltpu.CompilerParams(
            dimension_semantics=("parallel",),
            vmem_limit_bytes=vmem_limit),
    )(q, k, v, attn_bias, w_qkv, b_qkv, wo_p, bo_p)


def _reference_mha(q, k, v, attn_bias, params, num_heads):
    """Pure-JAX mirror of the PyTorch forward for validation."""
    wq, bq, wk, bk, wv, bv, wo, bo = params
    B, S, H = q.shape
    d_k = H // num_heads
    scale = d_k ** (-0.5)

    def lin(x, w, b):
        return x @ w.T + b

    qp = lin(q, wq, bq).reshape(B, S, num_heads, d_k).transpose(0, 2, 1, 3)
    kp = lin(k, wk, bk).reshape(B, S, num_heads, d_k).transpose(0, 2, 1, 3)
    vp = lin(v, wv, bv).reshape(B, S, num_heads, d_k).transpose(0, 2, 1, 3)

    scores = (qp * scale) @ kp.transpose(0, 1, 3, 2) + attn_bias
    attn = jax.nn.softmax(scores, axis=3)
    attn = jnp.where(jnp.isnan(attn), jnp.zeros_like(attn), attn)
    ctx = attn @ vp                                  # (B, nH, S, d_k)
    ctx = ctx.transpose(0, 2, 1, 3).reshape(B, S, H)
    return lin(ctx, wo, bo)


def _init_linear(key, in_dim, out_dim):
    # torch.nn.Linear default init: U(-1/sqrt(in), 1/sqrt(in)) for W and b.
    kw, kb = jax.random.split(key)
    bound = 1.0 / (in_dim ** 0.5)
    w = jax.random.uniform(kw, (out_dim, in_dim), jnp.float32, -bound, bound)
    b = jax.random.uniform(kb, (out_dim,), jnp.float32, -bound, bound)
    return w, b


if __name__ == "__main__":
    B, S, H = 2, 8, 32
    num_heads = 4

    root = jax.random.PRNGKey(0)
    kq, kk, kv, kbias, k1, k2, k3, k4 = jax.random.split(root, 8)

    q = jax.random.normal(kq, (B, S, H), jnp.float32)
    k = jax.random.normal(kk, (B, S, H), jnp.float32)
    v = jax.random.normal(kv, (B, S, H), jnp.float32)
    attn_bias = 0.1 * jax.random.normal(kbias, (B, num_heads, S, S), jnp.float32)
    # One fully -inf-masked row: exercises torch's where(isnan, 0, softmax).
    attn_bias = attn_bias.at[0, 0, 0, :].set(-jnp.inf)

    wq, bq = _init_linear(k1, H, H)
    wk, bk = _init_linear(k2, H, H)
    wv, bv = _init_linear(k3, H, H)
    wo, bo = _init_linear(k4, H, H)
    params = (wq, bq, wk, bk, wv, bv, wo, bo)

    ref = _reference_mha(q, k, v, attn_bias, params, num_heads)

    # f32 path: tight check against the torch-equivalent reference.
    packed_f32 = pack_mha_params(params, num_heads, compute_dtype=jnp.float32)
    out_f32 = jax.block_until_ready(
        multi_head_attention(q, k, v, attn_bias, packed_f32, num_heads))
    assert out_f32.shape == q.shape
    assert jnp.allclose(out_f32, ref, atol=1e-4, rtol=1e-4), \
        f"f32 max abs err = {jnp.max(jnp.abs(out_f32 - ref))}"

    # bf16 MXU path (review-recommended fast path): looser tolerance.
    packed_bf16 = pack_mha_params(params, num_heads, compute_dtype=jnp.bfloat16)
    out_bf16 = jax.block_until_ready(
        multi_head_attention(q, k, v, attn_bias, packed_bf16, num_heads))
    assert out_bf16.shape == q.shape
    assert jnp.allclose(out_bf16, ref, atol=5e-2, rtol=5e-2), \
        f"bf16 max abs err = {jnp.max(jnp.abs(out_bf16 - ref))}"

    print("KERNEL_OK")
</pallas_src>

<mosaic_0001>
module attributes {stable_mosaic.version = 11 : i64} {
  func.func @_mha_kernel(%arg0: i32, %arg1: memref<1x8x32xf32, #tpu.memory_space<vmem>>, %arg2: memref<1x8x32xf32, #tpu.memory_space<vmem>>, %arg3: memref<1x8x32xf32, #tpu.memory_space<vmem>>, %arg4: memref<1x4x8x8xf32, #tpu.memory_space<vmem>>, %arg5: memref<3x32x32xf32, #tpu.memory_space<vmem>>, %arg6: memref<3x1x32xf32, #tpu.memory_space<vmem>>, %arg7: memref<32x32xf32, #tpu.memory_space<vmem>>, %arg8: memref<1x32xf32, #tpu.memory_space<vmem>>, %arg9: memref<1x8x32xf32, #tpu.memory_space<vmem>>) attributes {dimension_semantics = [#tpu.dimension_semantics<parallel>], iteration_bounds = array<i64: 2>, scalar_prefetch = 0 : i64, scratch_operands = 0 : i64, tpu.core_type = #tpu.core_type<tc>, window_params = [{transform_indices = @transform_0, window_bounds = array<i64: 1, 8, 32>}, {transform_indices = @transform_1, window_bounds = array<i64: 1, 8, 32>}, {transform_indices = @transform_2, window_bounds = array<i64: 1, 8, 32>}, {transform_indices = @transform_3, window_bounds = array<i64: 1, 4, 8, 8>}, {pipeline_mode = #tpu.pipeline_mode<synchronous>, transform_indices = @transform_4, window_bounds = array<i64: 3, 32, 32>}, {pipeline_mode = #tpu.pipeline_mode<synchronous>, transform_indices = @transform_5, window_bounds = array<i64: 3, 1, 32>}, {pipeline_mode = #tpu.pipeline_mode<synchronous>, transform_indices = @transform_6, window_bounds = array<i64: 32, 32>}, {pipeline_mode = #tpu.pipeline_mode<synchronous>, transform_indices = @transform_7, window_bounds = array<i64: 1, 32>}, {transform_indices = @transform_8, window_bounds = array<i64: 1, 8, 32>}]} {
    %c0 = arith.constant 0 : index
    %c0_0 = arith.constant 0 : index
    %c0_1 = arith.constant 0 : index
    %0 = vector.load %arg1[%c0, %c0_0, %c0_1] : memref<1x8x32xf32, #tpu.memory_space<vmem>>, vector<1x8x32xf32>
    %1 = vector.shape_cast %0 : vector<1x8x32xf32> to vector<8x32xf32>
    %c0_2 = arith.constant 0 : index
    %c0_3 = arith.constant 0 : index
    %c0_4 = arith.constant 0 : index
    %2 = vector.load %arg5[%c0_2, %c0_3, %c0_4] : memref<3x32x32xf32, #tpu.memory_space<vmem>>, vector<1x32x32xf32>
    %3 = vector.shape_cast %2 : vector<1x32x32xf32> to vector<32x32xf32>
    %c0_5 = arith.constant 0 : index
    %c0_6 = arith.constant 0 : index
    %c0_7 = arith.constant 0 : index
    %4 = vector.load %arg6[%c0_5, %c0_6, %c0_7] : memref<3x1x32xf32, #tpu.memory_space<vmem>>, vector<1x1x32xf32>
    %5 = vector.shape_cast %4 : vector<1x1x32xf32> to vector<1x32xf32>
    %cst = arith.constant dense<0.000000e+00> : vector<8x32xf32>
    %6 = tpu.matmul %1, %3, %cst {dimension_numbers = #tpu.dot_dimension_numbers<[1], [0], [0], [1], [0, 0, 1, 1], [], []>} : vector<8x32xf32>, vector<32x32xf32>, vector<8x32xf32> -> vector<8x32xf32>
    %7 = vector.broadcast %5 : vector<1x32xf32> to vector<8x32xf32>
    %8 = arith.addf %6, %7 : vector<8x32xf32>
    %c0_8 = arith.constant 0 : index
    %c0_9 = arith.constant 0 : index
    %c0_10 = arith.constant 0 : index
    %9 = vector.load %arg2[%c0_8, %c0_9, %c0_10] : memref<1x8x32xf32, #tpu.memory_space<vmem>>, vector<1x8x32xf32>
    %10 = vector.shape_cast %9 : vector<1x8x32xf32> to vector<8x32xf32>
    %c1 = arith.constant 1 : index
    %c0_11 = arith.constant 0 : index
    %c0_12 = arith.constant 0 : index
    %11 = vector.load %arg5[%c1, %c0_11, %c0_12] : memref<3x32x32xf32, #tpu.memory_space<vmem>>, vector<1x32x32xf32>
    %12 = vector.shape_cast %11 : vector<1x32x32xf32> to vector<32x32xf32>
    %c1_13 = arith.constant 1 : index
    %c0_14 = arith.constant 0 : index
    %c0_15 = arith.constant 0 : index
    %13 = vector.load %arg6[%c1_13, %c0_14, %c0_15] : memref<3x1x32xf32, #tpu.memory_space<vmem>>, vector<1x1x32xf32>
    %14 = vector.shape_cast %13 : vector<1x1x32xf32> to vector<1x32xf32>
    %cst_16 = arith.constant dense<0.000000e+00> : vector<8x32xf32>
    %15 = tpu.matmul %10, %12, %cst_16 {dimension_numbers = #tpu.dot_dimension_numbers<[1], [0], [0], [1], [0, 0, 1, 1], [], []>} : vector<8x32xf32>, vector<32x32xf32>, vector<8x32xf32> -> vector<8x32xf32>
    %16 = vector.broadcast %14 : vector<1x32xf32> to vector<8x32xf32>
    %17 = arith.addf %15, %16 : vector<8x32xf32>
    %c0_17 = arith.constant 0 : index
    %c0_18 = arith.constant 0 : index
    %c0_19 = arith.constant 0 : index
    %18 = vector.load %arg3[%c0_17, %c0_18, %c0_19] : memref<1x8x32xf32, #tpu.memory_space<vmem>>, vector<1x8x32xf32>
    %19 = vector.shape_cast %18 : vector<1x8x32xf32> to vector<8x32xf32>
    %c2 = arith.constant 2 : index
    %c0_20 = arith.constant 0 : index
    %c0_21 = arith.constant 0 : index
    %20 = vector.load %arg5[%c2, %c0_20, %c0_21] : memref<3x32x32xf32, #tpu.memory_space<vmem>>, vector<1x32x32xf32>
    %21 = vector.shape_cast %20 : vector<1x32x32xf32> to vector<32x32xf32>
    %c2_22 = arith.constant 2 : index
    %c0_23 = arith.constant 0 : index
    %c0_24 = arith.constant 0 : index
    %22 = vector.load %arg6[%c2_22, %c0_23, %c0_24] : memref<3x1x32xf32, #tpu.memory_space<vmem>>, vector<1x1x32xf32>
    %23 = vector.shape_cast %22 : vector<1x1x32xf32> to vector<1x32xf32>
    %cst_25 = arith.constant dense<0.000000e+00> : vector<8x32xf32>
    %24 = tpu.matmul %19, %21, %cst_25 {dimension_numbers = #tpu.dot_dimension_numbers<[1], [0], [0], [1], [0, 0, 1, 1], [], []>} : vector<8x32xf32>, vector<32x32xf32>, vector<8x32xf32> -> vector<8x32xf32>
    %25 = vector.broadcast %23 : vector<1x32xf32> to vector<8x32xf32>
    %26 = arith.addf %24, %25 : vector<8x32xf32>
    %c0_26 = arith.constant 0 : index
    %c0_27 = arith.constant 0 : index
    %c0_28 = arith.constant 0 : index
    %c0_29 = arith.constant 0 : index
    %27 = vector.load %arg4[%c0_26, %c0_27, %c0_28, %c0_29] : memref<1x4x8x8xf32, #tpu.memory_space<vmem>>, vector<1x4x8x8xf32>
    %28 = vector.extract_strided_slice %8 {offsets = [0, 0], sizes = [8, 8], strides = [1, 1]} : vector<8x32xf32> to vector<8x8xf32>
    %29 = vector.shape_cast %28 : vector<8x8xf32> to vector<1x8x8xf32>
    %30 = vector.extract_strided_slice %17 {offsets = [0, 0], sizes = [8, 8], strides = [1, 1]} : vector<8x32xf32> to vector<8x8xf32>
    %31 = vector.shape_cast %30 : vector<8x8xf32> to vector<1x8x8xf32>
    %32 = vector.extract_strided_slice %26 {offsets = [0, 0], sizes = [8, 8], strides = [1, 1]} : vector<8x32xf32> to vector<8x8xf32>
    %33 = vector.shape_cast %32 : vector<8x8xf32> to vector<1x8x8xf32>
    "tpu.trace_start"() <{level = 10 : i32, message = "bqd,bkd->bqk"}> : () -> ()
    %cst_30 = arith.constant dense<0.000000e+00> : vector<1x8x8xf32>
    %34 = tpu.matmul %29, %31, %cst_30 {dimension_numbers = #tpu.dot_dimension_numbers<[2], [2], [1], [1], [0, 0, 0, 1, 1, 1], [0], [0]>} : vector<1x8x8xf32>, vector<1x8x8xf32>, vector<1x8x8xf32> -> vector<1x8x8xf32>
    "tpu.trace_stop"() : () -> ()
    %35 = vector.extract_strided_slice %27 {offsets = [0, 0, 0, 0], sizes = [1, 1, 8, 8], strides = [1, 1, 1, 1]} : vector<1x4x8x8xf32> to vector<1x1x8x8xf32>
    %36 = vector.shape_cast %35 : vector<1x1x8x8xf32> to vector<1x8x8xf32>
    %37 = arith.addf %34, %36 : vector<1x8x8xf32>
    %cst_31 = arith.constant dense<0xFF800000> : vector<1x8xf32>
    %38 = vector.multi_reduction <maximumf>, %37, %cst_31 [2] : vector<1x8x8xf32> to vector<1x8xf32>
    %39 = vector.shape_cast %38 : vector<1x8xf32> to vector<1x8x1xf32>
    %40 = tpu.weird %39 : vector<1x8x1xf32> -> vector<1x8x1xi1>
    %cst_32 = arith.constant dense<true> : vector<1x8x1xi1>
    %41 = arith.xori %40, %cst_32 : vector<1x8x1xi1>
    %cst_33 = arith.constant 0.000000e+00 : f32
    %42 = vector.broadcast %cst_33 : f32 to vector<1x8x1xf32>
    %43 = arith.select %41, %39, %42 : vector<1x8x1xi1>, vector<1x8x1xf32>
    %44 = vector.broadcast %43 : vector<1x8x1xf32> to vector<1x8x8xf32>
    %45 = arith.subf %37, %44 : vector<1x8x8xf32>
    %46 = math.exp %45 : vector<1x8x8xf32>
    %cst_34 = arith.constant dense<0.000000e+00> : vector<1x8xf32>
    %47 = vector.multi_reduction <add>, %46, %cst_34 [2] : vector<1x8x8xf32> to vector<1x8xf32>
    %48 = vector.shape_cast %47 : vector<1x8xf32> to vector<1x8x1xf32>
    %cst_35 = arith.constant 0.000000e+00 : f32
    %49 = vector.broadcast %cst_35 : f32 to vector<1x8x1xf32>
    %50 = arith.cmpf oeq, %48, %49 : vector<1x8x1xf32>
    %cst_36 = arith.constant 1.000000e+00 : f32
    %51 = vector.broadcast %cst_36 : f32 to vector<1x8x1xf32>
    %52 = arith.select %50, %51, %48 : vector<1x8x1xi1>, vector<1x8x1xf32>
    %53 = tpu.reciprocal %52 : vector<1x8x1xf32> -> vector<1x8x1xf32>
    %54 = vector.broadcast %53 : vector<1x8x1xf32> to vector<1x8x8xf32>
    %55 = arith.mulf %46, %54 : vector<1x8x8xf32>
    "tpu.trace_start"() <{level = 10 : i32, message = "bqk,bkd->bqd"}> : () -> ()
    %cst_37 = arith.constant dense<0.000000e+00> : vector<1x8x8xf32>
    %56 = tpu.matmul %55, %33, %cst_37 {dimension_numbers = #tpu.dot_dimension_numbers<[2], [1], [1], [2], [0, 0, 0, 1, 1, 2], [0], [0]>} : vector<1x8x8xf32>, vector<1x8x8xf32>, vector<1x8x8xf32> -> vector<1x8x8xf32>
    "tpu.trace_stop"() : () -> ()
    %57 = vector.extract_strided_slice %8 {offsets = [0, 8], sizes = [8, 8], strides = [1, 1]} : vector<8x32xf32> to vector<8x8xf32>
    %58 = vector.shape_cast %57 : vector<8x8xf32> to vector<1x8x8xf32>
    %59 = vector.extract_strided_slice %17 {offsets = [0, 8], sizes = [8, 8], strides = [1, 1]} : vector<8x32xf32> to vector<8x8xf32>
    %60 = vector.shape_cast %59 : vector<8x8xf32> to vector<1x8x8xf32>
    %61 = vector.extract_strided_slice %26 {offsets = [0, 8], sizes = [8, 8], strides = [1, 1]} : vector<8x32xf32> to vector<8x8xf32>
    %62 = vector.shape_cast %61 : vector<8x8xf32> to vector<1x8x8xf32>
    "tpu.trace_start"() <{level = 10 : i32, message = "bqd,bkd->bqk"}> : () -> ()
    %cst_38 = arith.constant dense<0.000000e+00> : vector<1x8x8xf32>
    %63 = tpu.matmul %58, %60, %cst_38 {dimension_numbers = #tpu.dot_dimension_numbers<[2], [2], [1], [1], [0, 0, 0, 1, 1, 1], [0], [0]>} : vector<1x8x8xf32>, vector<1x8x8xf32>, vector<1x8x8xf32> -> vector<1x8x8xf32>
    "tpu.trace_stop"() : () -> ()
    %64 = vector.extract_strided_slice %27 {offsets = [0, 1, 0, 0], sizes = [1, 1, 8, 8], strides = [1, 1, 1, 1]} : vector<1x4x8x8xf32> to vector<1x1x8x8xf32>
    %65 = vector.shape_cast %64 : vector<1x1x8x8xf32> to vector<1x8x8xf32>
    %66 = arith.addf %63, %65 : vector<1x8x8xf32>
    %cst_39 = arith.constant dense<0xFF800000> : vector<1x8xf32>
    %67 = vector.multi_reduction <maximumf>, %66, %cst_39 [2] : vector<1x8x8xf32> to vector<1x8xf32>
    %68 = vector.shape_cast %67 : vector<1x8xf32> to vector<1x8x1xf32>
    %69 = tpu.weird %68 : vector<1x8x1xf32> -> vector<1x8x1xi1>
    %cst_40 = arith.constant dense<true> : vector<1x8x1xi1>
    %70 = arith.xori %69, %cst_40 : vector<1x8x1xi1>
    %cst_41 = arith.constant 0.000000e+00 : f32
    %71 = vector.broadcast %cst_41 : f32 to vector<1x8x1xf32>
    %72 = arith.select %70, %68, %71 : vector<1x8x1xi1>, vector<1x8x1xf32>
    %73 = vector.broadcast %72 : vector<1x8x1xf32> to vector<1x8x8xf32>
    %74 = arith.subf %66, %73 : vector<1x8x8xf32>
    %75 = math.exp %74 : vector<1x8x8xf32>
    %cst_42 = arith.constant dense<0.000000e+00> : vector<1x8xf32>
    %76 = vector.multi_reduction <add>, %75, %cst_42 [2] : vector<1x8x8xf32> to vector<1x8xf32>
    %77 = vector.shape_cast %76 : vector<1x8xf32> to vector<1x8x1xf32>
    %cst_43 = arith.constant 0.000000e+00 : f32
    %78 = vector.broadcast %cst_43 : f32 to vector<1x8x1xf32>
    %79 = arith.cmpf oeq, %77, %78 : vector<1x8x1xf32>
    %cst_44 = arith.constant 1.000000e+00 : f32
    %80 = vector.broadcast %cst_44 : f32 to vector<1x8x1xf32>
    %81 = arith.select %79, %80, %77 : vector<1x8x1xi1>, vector<1x8x1xf32>
    %82 = tpu.reciprocal %81 : vector<1x8x1xf32> -> vector<1x8x1xf32>
    %83 = vector.broadcast %82 : vector<1x8x1xf32> to vector<1x8x8xf32>
    %84 = arith.mulf %75, %83 : vector<1x8x8xf32>
    "tpu.trace_start"() <{level = 10 : i32, message = "bqk,bkd->bqd"}> : () -> ()
    %cst_45 = arith.constant dense<0.000000e+00> : vector<1x8x8xf32>
    %85 = tpu.matmul %84, %62, %cst_45 {dimension_numbers = #tpu.dot_dimension_numbers<[2], [1], [1], [2], [0, 0, 0, 1, 1, 2], [0], [0]>} : vector<1x8x8xf32>, vector<1x8x8xf32>, vector<1x8x8xf32> -> vector<1x8x8xf32>
    "tpu.trace_stop"() : () -> ()
    %86 = vector.extract_strided_slice %8 {offsets = [0, 16], sizes = [8, 8], strides = [1, 1]} : vector<8x32xf32> to vector<8x8xf32>
    %87 = vector.shape_cast %86 : vector<8x8xf32> to vector<1x8x8xf32>
    %88 = vector.extract_strided_slice %17 {offsets = [0, 16], sizes = [8, 8], strides = [1, 1]} : vector<8x32xf32> to vector<8x8xf32>
    %89 = vector.shape_cast %88 : vector<8x8xf32> to vector<1x8x8xf32>
    %90 = vector.extract_strided_slice %26 {offsets = [0, 16], sizes = [8, 8], strides = [1, 1]} : vector<8x32xf32> to vector<8x8xf32>
    %91 = vector.shape_cast %90 : vector<8x8xf32> to vector<1x8x8xf32>
    "tpu.trace_start"() <{level = 10 : i32, message = "bqd,bkd->bqk"}> : () -> ()
    %cst_46 = arith.constant dense<0.000000e+00> : vector<1x8x8xf32>
    %92 = tpu.matmul %87, %89, %cst_46 {dimension_numbers = #tpu.dot_dimension_numbers<[2], [2], [1], [1], [0, 0, 0, 1, 1, 1], [0], [0]>} : vector<1x8x8xf32>, vector<1x8x8xf32>, vector<1x8x8xf32> -> vector<1x8x8xf32>
    "tpu.trace_stop"() : () -> ()
    %93 = vector.extract_strided_slice %27 {offsets = [0, 2, 0, 0], sizes = [1, 1, 8, 8], strides = [1, 1, 1, 1]} : vector<1x4x8x8xf32> to vector<1x1x8x8xf32>
    %94 = vector.shape_cast %93 : vector<1x1x8x8xf32> to vector<1x8x8xf32>
    %95 = arith.addf %92, %94 : vector<1x8x8xf32>
    %cst_47 = arith.constant dense<0xFF800000> : vector<1x8xf32>
    %96 = vector.multi_reduction <maximumf>, %95, %cst_47 [2] : vector<1x8x8xf32> to vector<1x8xf32>
    %97 = vector.shape_cast %96 : vector<1x8xf32> to vector<1x8x1xf32>
    %98 = tpu.weird %97 : vector<1x8x1xf32> -> vector<1x8x1xi1>
    %cst_48 = arith.constant dense<true> : vector<1x8x1xi1>
    %99 = arith.xori %98, %cst_48 : vector<1x8x1xi1>
    %cst_49 = arith.constant 0.000000e+00 : f32
    %100 = vector.broadcast %cst_49 : f32 to vector<1x8x1xf32>
    %101 = arith.select %99, %97, %100 : vector<1x8x1xi1>, vector<1x8x1xf32>
    %102 = vector.broadcast %101 : vector<1x8x1xf32> to vector<1x8x8xf32>
    %103 = arith.subf %95, %102 : vector<1x8x8xf32>
    %104 = math.exp %103 : vector<1x8x8xf32>
    %cst_50 = arith.constant dense<0.000000e+00> : vector<1x8xf32>
    %105 = vector.multi_reduction <add>, %104, %cst_50 [2] : vector<1x8x8xf32> to vector<1x8xf32>
    %106 = vector.shape_cast %105 : vector<1x8xf32> to vector<1x8x1xf32>
    %cst_51 = arith.constant 0.000000e+00 : f32
    %107 = vector.broadcast %cst_51 : f32 to vector<1x8x1xf32>
    %108 = arith.cmpf oeq, %106, %107 : vector<1x8x1xf32>
    %cst_52 = arith.constant 1.000000e+00 : f32
    %109 = vector.broadcast %cst_52 : f32 to vector<1x8x1xf32>
    %110 = arith.select %108, %109, %106 : vector<1x8x1xi1>, vector<1x8x1xf32>
    %111 = tpu.reciprocal %110 : vector<1x8x1xf32> -> vector<1x8x1xf32>
    %112 = vector.broadcast %111 : vector<1x8x1xf32> to vector<1x8x8xf32>
    %113 = arith.mulf %104, %112 : vector<1x8x8xf32>
    "tpu.trace_start"() <{level = 10 : i32, message = "bqk,bkd->bqd"}> : () -> ()
    %cst_53 = arith.constant dense<0.000000e+00> : vector<1x8x8xf32>
    %114 = tpu.matmul %113, %91, %cst_53 {dimension_numbers = #tpu.dot_dimension_numbers<[2], [1], [1], [2], [0, 0, 0, 1, 1, 2], [0], [0]>} : vector<1x8x8xf32>, vector<1x8x8xf32>, vector<1x8x8xf32> -> vector<1x8x8xf32>
    "tpu.trace_stop"() : () -> ()
    %115 = vector.extract_strided_slice %8 {offsets = [0, 24], sizes = [8, 8], strides = [1, 1]} : vector<8x32xf32> to vector<8x8xf32>
    %116 = vector.shape_cast %115 : vector<8x8xf32> to vector<1x8x8xf32>
    %117 = vector.extract_strided_slice %17 {offsets = [0, 24], sizes = [8, 8], strides = [1, 1]} : vector<8x32xf32> to vector<8x8xf32>
    %118 = vector.shape_cast %117 : vector<8x8xf32> to vector<1x8x8xf32>
    %119 = vector.extract_strided_slice %26 {offsets = [0, 24], sizes = [8, 8], strides = [1, 1]} : vector<8x32xf32> to vector<8x8xf32>
    %120 = vector.shape_cast %119 : vector<8x8xf32> to vector<1x8x8xf32>
    "tpu.trace_start"() <{level = 10 : i32, message = "bqd,bkd->bqk"}> : () -> ()
    %cst_54 = arith.constant dense<0.000000e+00> : vector<1x8x8xf32>
    %121 = tpu.matmul %116, %118, %cst_54 {dimension_numbers = #tpu.dot_dimension_numbers<[2], [2], [1], [1], [0, 0, 0, 1, 1, 1], [0], [0]>} : vector<1x8x8xf32>, vector<1x8x8xf32>, vector<1x8x8xf32> -> vector<1x8x8xf32>
    "tpu.trace_stop"() : () -> ()
    %122 = vector.extract_strided_slice %27 {offsets = [0, 3, 0, 0], sizes = [1, 1, 8, 8], strides = [1, 1, 1, 1]} : vector<1x4x8x8xf32> to vector<1x1x8x8xf32>
    %123 = vector.shape_cast %122 : vector<1x1x8x8xf32> to vector<1x8x8xf32>
    %124 = arith.addf %121, %123 : vector<1x8x8xf32>
    %cst_55 = arith.constant dense<0xFF800000> : vector<1x8xf32>
    %125 = vector.multi_reduction <maximumf>, %124, %cst_55 [2] : vector<1x8x8xf32> to vector<1x8xf32>
    %126 = vector.shape_cast %125 : vector<1x8xf32> to vector<1x8x1xf32>
    %127 = tpu.weird %126 : vector<1x8x1xf32> -> vector<1x8x1xi1>
    %cst_56 = arith.constant dense<true> : vector<1x8x1xi1>
    %128 = arith.xori %127, %cst_56 : vector<1x8x1xi1>
    %cst_57 = arith.constant 0.000000e+00 : f32
    %129 = vector.broadcast %cst_57 : f32 to vector<1x8x1xf32>
    %130 = arith.select %128, %126, %129 : vector<1x8x1xi1>, vector<1x8x1xf32>
    %131 = vector.broadcast %130 : vector<1x8x1xf32> to vector<1x8x8xf32>
    %132 = arith.subf %124, %131 : vector<1x8x8xf32>
    %133 = math.exp %132 : vector<1x8x8xf32>
    %cst_58 = arith.constant dense<0.000000e+00> : vector<1x8xf32>
    %134 = vector.multi_reduction <add>, %133, %cst_58 [2] : vector<1x8x8xf32> to vector<1x8xf32>
    %135 = vector.shape_cast %134 : vector<1x8xf32> to vector<1x8x1xf32>
    %cst_59 = arith.constant 0.000000e+00 : f32
    %136 = vector.broadcast %cst_59 : f32 to vector<1x8x1xf32>
    %137 = arith.cmpf oeq, %135, %136 : vector<1x8x1xf32>
    %cst_60 = arith.constant 1.000000e+00 : f32
    %138 = vector.broadcast %cst_60 : f32 to vector<1x8x1xf32>
    %139 = arith.select %137, %138, %135 : vector<1x8x1xi1>, vector<1x8x1xf32>
    %140 = tpu.reciprocal %139 : vector<1x8x1xf32> -> vector<1x8x1xf32>
    %141 = vector.broadcast %140 : vector<1x8x1xf32> to vector<1x8x8xf32>
    %142 = arith.mulf %133, %141 : vector<1x8x8xf32>
    "tpu.trace_start"() <{level = 10 : i32, message = "bqk,bkd->bqd"}> : () -> ()
    %cst_61 = arith.constant dense<0.000000e+00> : vector<1x8x8xf32>
    %143 = tpu.matmul %142, %120, %cst_61 {dimension_numbers = #tpu.dot_dimension_numbers<[2], [1], [1], [2], [0, 0, 0, 1, 1, 2], [0], [0]>} : vector<1x8x8xf32>, vector<1x8x8xf32>, vector<1x8x8xf32> -> vector<1x8x8xf32>
    "tpu.trace_stop"() : () -> ()
    %144 = tpu.concatenate %56, %85, %114, %143 in 2 : vector<1x8x8xf32>, vector<1x8x8xf32>, vector<1x8x8xf32>, vector<1x8x8xf32> -> vector<1x8x32xf32>
    %145 = vector.shape_cast %144 : vector<1x8x32xf32> to vector<8x32xf32>
    %c0_62 = arith.constant 0 : index
    %c0_63 = arith.constant 0 : index
    %146 = vector.load %arg7[%c0_62, %c0_63] : memref<32x32xf32, #tpu.memory_space<vmem>>, vector<32x32xf32>
    %cst_64 = arith.constant dense<0.000000e+00> : vector<8x32xf32>
    %147 = tpu.matmul %145, %146, %cst_64 {dimension_numbers = #tpu.dot_dimension_numbers<[1], [0], [0], [1], [0, 0, 1, 1], [], []>} : vector<8x32xf32>, vector<32x32xf32>, vector<8x32xf32> -> vector<8x32xf32>
    %c0_65 = arith.constant 0 : index
    %c0_66 = arith.constant 0 : index
    %148 = vector.load %arg8[%c0_65, %c0_66] : memref<1x32xf32, #tpu.memory_space<vmem>>, vector<1x32xf32>
    %149 = vector.broadcast %148 : vector<1x32xf32> to vector<8x32xf32>
    %150 = arith.addf %147, %149 : vector<8x32xf32>
    %151 = vector.shape_cast %150 : vector<8x32xf32> to vector<1x8x32xf32>
    %c0_67 = arith.constant 0 : index
    %c0_68 = arith.constant 0 : index
    %c0_69 = arith.constant 0 : index
    %152 = vector.load %arg9[%c0_67, %c0_68, %c0_69] : memref<1x8x32xf32, #tpu.memory_space<vmem>>, vector<1x8x32xf32>
    tpu.vector_store %arg9[%c0_67, %c0_68, %c0_69], %151 {strides = array<i32>} : memref<1x8x32xf32, #tpu.memory_space<vmem>>, vector<1x8x32xf32>,
    return
  }
  func.func @transform_0(%arg0: i32) -> (i32, i32, i32) {
    %c0_i32 = arith.constant 0 : i32
    %c0_i32_0 = arith.constant 0 : i32
    %c0_i32_1 = arith.constant 0 : i32
    return %arg0, %c0_i32, %c0_i32_0 : i32, i32, i32
  }
  func.func @transform_1(%arg0: i32) -> (i32, i32, i32) {
    %c0_i32 = arith.constant 0 : i32
    %c0_i32_0 = arith.constant 0 : i32
    %c0_i32_1 = arith.constant 0 : i32
    return %arg0, %c0_i32, %c0_i32_0 : i32, i32, i32
  }
  func.func @transform_2(%arg0: i32) -> (i32, i32, i32) {
    %c0_i32 = arith.constant 0 : i32
    %c0_i32_0 = arith.constant 0 : i32
    %c0_i32_1 = arith.constant 0 : i32
    return %arg0, %c0_i32, %c0_i32_0 : i32, i32, i32
  }
  func.func @transform_3(%arg0: i32) -> (i32, i32, i32, i32) {
    %c0_i32 = arith.constant 0 : i32
    %c0_i32_0 = arith.constant 0 : i32
    %c0_i32_1 = arith.constant 0 : i32
    %c0_i32_2 = arith.constant 0 : i32
    return %arg0, %c0_i32, %c0_i32_0, %c0_i32_1 : i32, i32, i32, i32
  }
  func.func @transform_4(%arg0: i32) -> (i32, i32, i32) {
    %c0_i32 = arith.constant 0 : i32
    %c0_i32_0 = arith.constant 0 : i32
    %c0_i32_1 = arith.constant 0 : i32
    %c0_i32_2 = arith.constant 0 : i32
    return %c0_i32, %c0_i32_0, %c0_i32_1 : i32, i32, i32
  }
  func.func @transform_5(%arg0: i32) -> (i32, i32, i32) {
    %c0_i32 = arith.constant 0 : i32
    %c0_i32_0 = arith.constant 0 : i32
    %c0_i32_1 = arith.constant 0 : i32
    %c0_i32_2 = arith.constant 0 : i32
    return %c0_i32, %c0_i32_0, %c0_i32_1 : i32, i32, i32
  }
  func.func @transform_6(%arg0: i32) -> (i32, i32) {
    %c0_i32 = arith.constant 0 : i32
    %c0_i32_0 = arith.constant 0 : i32
    %c0_i32_1 = arith.constant 0 : i32
    return %c0_i32, %c0_i32_0 : i32, i32
  }
  func.func @transform_7(%arg0: i32) -> (i32, i32) {
    %c0_i32 = arith.constant 0 : i32
    %c0_i32_0 = arith.constant 0 : i32
    %c0_i32_1 = arith.constant 0 : i32
    return %c0_i32, %c0_i32_0 : i32, i32
  }
  func.func @transform_8(%arg0: i32) -> (i32, i32, i32) {
    %c0_i32 = arith.constant 0 : i32
    %c0_i32_0 = arith.constant 0 : i32
    %c0_i32_1 = arith.constant 0 : i32
    return %arg0, %c0_i32, %c0_i32_0 : i32, i32, i32
  }
}

</mosaic_0001>

<bundles_post_ra>
// kernel: tpu_custom_call.1
= control target key start
LH: loop header
LB: loop body
LE: loop exit
PB: predicated region body
PF: predicated region fallthrough
CT: control target
= control target key end

     0   :  { %s2682_s0 = inlined_call_operand.hbm [shape: f32[2,8,32], index: 0, kind: input, shape index: {}]   ;;  %s2683_s1 = inlined_call_operand.hbm [shape: f32[2,8,32], index: 1, kind: input, shape index: {}]   ;;  %s2684_s2 = inlined_call_operand.hbm [shape: f32[2,8,32], index: 2, kind: input, shape index: {}]   ;;  %s2685_s3 = inlined_call_operand.hbm [shape: f32[2,4,8,8], index: 3, kind: input, shape index: {}]   ;;  %s2686_s4 = inlined_call_operand.hbm [shape: f32[3,32,32], index: 4, kind: input, shape index: {}]   ;;  %s2687_s5 = inlined_call_operand.vmem [shape: f32[3,1,32], index: 5, kind: input, shape index: {}]   ;;  %s2688_s6 = inlined_call_operand.hbm [shape: f32[32,32], index: 6, kind: input, shape index: {}]   ;;  %s2689_s7 = inlined_call_operand.vmem [shape: f32[1,32], index: 7, kind: input, shape index: {}]   ;;  %s2690_s8 = inlined_call_operand.hbm [shape: f32[2,8,32], index: 8, kind: output, shape index: {}]  }
   0x1   :  { %2711 = sst [smem:[#allocation26_spill]] %s2683_s1 }
   0x2   :  { %2712 = sst [smem:[#allocation27_spill]] %s2686_s4 }
   0x3   :  { %2713 = sst [smem:[#allocation28_spill]] %s2688_s6 }
   0x4   :  { %2714 = sst [smem:[#allocation29_spill]] %s2689_s7 }
   0x5   :  { %2715 = sst [smem:[#allocation30_spill]] %s2690_s8 }
   0x6   :  { %13 = vsyncpa [#allocation3], 0 }
   0x7   :  { %15 = vsyncpa [#allocation3 + $0x1], 0 }
   0x8   :  { %16 = vsyncpa [#allocation6], 0 }
   0x9   :  { %18 = vsyncpa [#allocation6 + $0x1], 0 }
   0xa   :  { %19 = vsyncpa [#allocation9], 0 }
   0xb   :  { %21 = vsyncpa [#allocation9 + $0x1], 0 }
   0xc   :  { %22 = vsyncpa [#allocation12], 0 }
   0xd   :  { %23 = vsyncpa [#allocation4], 0 }
   0xe   :  { %25 = vsyncpa [#allocation4 + $0x1], 0  ;;  %s2260_s27 = smov 0   ;;  %s2262_s28 = smov 0  }
   0xf   :  { %s2264_s29 = smov 0   ;;  %s2266_s30 = smov 0  }
  0x10 LB: > { %2716 = sst [smem:[#allocation20_spill]] %s2183_s27  ;;  %s2281_s9 = sadd.s32 4294967295, %s2195_s30   ;;  %s2195_s30 = sphi %s2266_s30, %s2751_s30   ;;  %s2191_s29 = sphi %s2264_s29, %s2753_s29   ;;  %s2187_s28 = sphi %s2262_s28, %s2755_s28   ;;  %s2183_s27 = sphi %s2260_s27, %s2754_s27  }
  0x11   : > { %2717 = sst [smem:[#allocation21_spill]] %s2191_s29  ;;  %s1673_s10 = sadd.s32 4294967294, %s2195_s30  }
  0x12   : > { %p51_p0 = scmp.ne.s32.totalorder %s2187_s28, %s2183_s27  ;;  %p2699_p1 = scmp.eq.s32.totalorder %s2281_s9, 0 }
  0x13   : > { %p237_p2 = scmp.eq.s32.totalorder %s2281_s9, 1  ;;  %p243_p3 = scmp.eq.s32.totalorder %s1673_s10, 1 }
  0x14   : > { %p2290_p4 = por %p2699_p1, %p51_p0  ;;  %p1674_p5 = scmp.ge.s32.totalorder %s2195_s30, 1 }
  0x15   : > { %p2295_p6 = por %p243_p3, %p51_p0  ;;  %p250_p7 = scmp.lt.s32.totalorder %s2195_s30, 3 }
  0x16   : > { %s2718_s11 = scalar_select %p2290_p4, 1, 0 }
  0x17   : > { %s2719_s12 = scalar_select %p2295_p6, 1, 0 }
  0x18   : > { %p2300_p8 = pnand %p1674_p5, %p250_p7  ;;  %s2197_s14 = smov [#allocation10]  }
  0x19   : > { %2720 = sst [smem:[#allocation22_spill]] %s2719_s12  ;;  %s262_s15 = sshll.u32 %s2197_s14, 4  ;;  %s263_s15 = int_to_ptr.vmem [resolvable:$true] %s262_s15 }
  0x1a   : > { %s2721_s13 = scalar_select %p2300_p8, 1, 0 }
  0x1b   : > { %p1860_p9 = pneg %p2300_p8  ;;  %s2314_s17 = sadd.s32 1, %s2195_s30  }
  0x1c   : > { %2723 = sst [smem:[#allocation23_spill]] %s2314_s17  ;;  %s38_s18 = sadd.s32 1, %s2191_s29 }
  0x1d   : > { %p2309_p11 = pnand %p1860_p9, %p2699_p1  ;;  %s35_s19 = ssub.s32 %s2195_s30, %s2314_s17 }
  0x1e   : > { %s1962_s20 = scalar_lea.vmem %s263_s15, 1536  ;;  %p1970_p5 = scmp.lt.s32.totalorder %s263_s15, %s263_s15 }
  0x1f   : > { %s2722_s16 = scalar_select %p2309_p11, 1, 0 }
  0x20   : > { %p2700_p12 = pneg %p2309_p11  ;;  %p1963_p13 = scmp.ne.s32.totalorder %s263_s15, %s1962_s20 }
  0x21   : > { %p1971_p7 = scmp.lt.s32.totalorder %s1962_s20, %s1962_s20 }
  0x22   : > { %p1965_p0 = pnand %p1963_p13, %p2700_p12 }
  0x23   : > { %p1972_p9 = por %p1971_p7, %p1970_p5 }
  0x24   : > { %p1966_p3 = pneg %p1965_p0 }
  0x26   : > { %p1973_p10 = pnand %p1972_p9, %p1966_p3 }
  0x28   : > { %1976 = shalt.err (!%p1973_p10)
}
  0x29   : > { %s2691_s21 = smov 128   ;;  %s2693_s22 = smov 8  }
  0x2a   : > { %s2724_s4 = sld [smem:[#allocation27_spill]]  ;;  %p36_p10 = scmp.eq.s32.totalorder %s35_s19, 0 }
  0x2b   : > { %p45_p13 = scmp.ne.s32.totalorder %s2191_s29, %s2187_s28  ;;  %p46_p0 = scmp.eq.s32.totalorder %s2195_s30, 0 }
  0x2c   : > { %p1886_p3 = scmp.lt.s32.totalorder %s2195_s30, 2  ;;  %s2346_s10 = sand.u32 1, %s2191_s29  }
  0x2d   : > { %s2337_s25 = scalar_select %p36_p10, %s2191_s29, %s38_s18  }
  0x2e   : > { %p47_p5 = por %p46_p0, %p45_p13  ;;  %p2341_p7 = por %p237_p2, %p45_p13 }
  0x2f   : > { %2725 = sst [smem:[#allocation24_spill]] %s2337_s25  ;;  %s2349_s14 = sshll.u32 %s2195_s30, 7 }
  0x30   : > { %1863 = dma.hbm_to_vmem [thread:$0]  (!%p2309_p11), %s2724_s4, 1536, %s263_s15, [#allocation9], %s2691_s21, %s2691_s21, %s2693_s22  }
  0x31   : > { %s2726_s26 = scalar_select %p2341_p7, 1, 0 }
  0x32   : > { %s2352_s15 = sshll.u32 %s2346_s10, 3  ;;  %p2354_p9 = pnand %p1886_p3, %p47_p5 }
  0x33   : > { %2727 = sst [smem:[#allocation25_spill]] %s2726_s26  ;;  %s2701_s18 = sand.u32 1, %s2195_s30  }
  0x34   : > { %s2729_s1 = sld [smem:[#allocation26_spill]]  ;;  %s317_s21 = scalar_lea.vmem [#allocation5], %s2352_s15 }
  0x35   : > { %s324_s22 = sshll.u32 %s317_s21, 4  ;;  %s2368_s4 = scalar_lea.sflag [#allocation6], %s2701_s18  ;;  %s325_s22 = int_to_ptr.vmem [resolvable:$true] %s324_s22 }
  0x36   : > { %p2374_p10 = pneg %p2354_p9 }
  0x3a   : > { %s2363_s24 = scalar_lea.hbm %s2729_s1, %s2349_s14  ;;  %s1982_s17 = scalar_lea.hbm %s2729_s1, 256 }
  0x3b   : > { %s1977_s25 = scalar_lea.hbm %s2363_s24, 128  ;;  %p1983_p3 = scmp.lt.s32.totalorder %s2363_s24, %s2729_s1 }
  0x3c   : > { %p1978_p2 = scmp.ne.s32.totalorder %s2363_s24, %s1977_s25  ;;  %p1984_p5 = scmp.lt.s32.totalorder %s1982_s17, %s1977_s25 }
  0x3e   : > { %p1980_p13 = pnand %p2374_p10, %p1978_p2  ;;  %p1985_p1 = por %p1984_p5, %p1983_p3 }
  0x40   : > { %p1981_p0 = pneg %p1980_p13 }
  0x42   : > { %p1986_p12 = pnand %p1985_p1, %p1981_p0 }
  0x44   : > { %1989 = shalt.err (!%p1986_p12)
}
  0x45   : > { %s1990_s18 = scalar_lea.vmem %s325_s22, 128  ;;  %s2200_s27 = smov [#allocation5]  }
  0x46   : > { %p1991_p6 = scmp.ne.s32.totalorder %s325_s22, %s1990_s18  ;;  %s1995_s8 = sshll.u32 %s2200_s27, 4  ;;  %s1996_s8 = int_to_ptr.vmem [resolvable:$false] %s1995_s8 }
  0x47   : > { %s1997_s7 = scalar_lea.vmem %s1996_s8, 256  ;;  %p1998_p2 = scmp.lt.s32.totalorder %s325_s22, %s1996_s8 }
  0x48   : > { %p1993_p7 = pnand %p1991_p6, %p2374_p10  ;;  %p1999_p13 = scmp.lt.s32.totalorder %s1997_s7, %s1990_s18 }
  0x4a   : > { %p1994_p4 = pneg %p1993_p7  ;;  %p2000_p8 = por %p1999_p13, %p1998_p2 }
  0x4c   : > { %p2001_p11 = pnand %p2000_p8, %p1994_p4 }
  0x4e   : > { %2004 = shalt.err (!%p2001_p11)
}
  0x4f   : > { %1873 = dma.hbm_to_vmem [thread:$0]  (!%p2354_p9), %s2363_s24, 128, %s325_s22, %s2368_s4  }
  0x50   : > { %s1684_s12 = sshll.u32 %s2346_s10, 5  ;;  %s2201_s17 = smov [#allocation11]  }
  0x51   : > { %s278_s25 = sshll.u32 %s2201_s17, 4  ;;  %s353_s20 = scalar_lea.vmem [#allocation8], %s1684_s12  ;;  %s279_s25 = int_to_ptr.vmem [resolvable:$true] %s278_s25 }
  0x52   : > { %s360_s23 = sshll.u32 %s353_s20, 4  ;;  %s2016_s8 = scalar_lea.vmem %s279_s25, 512  ;;  %s2394_s23 = int_to_ptr.vmem [resolvable:$true] %s360_s23 }
  0x53   : > { %p2017_p1 = scmp.ne.s32.totalorder %s279_s25, %s2016_s8  ;;  %p2731_p6 = scmp.ne.s32.totalorder %s2722_s16, 0 }
  0x54   : > { %p2024_p12 = scmp.lt.s32.totalorder %s279_s25, %s279_s25  ;;  %p2025_p7 = scmp.lt.s32.totalorder %s2016_s8, %s2016_s8 }
  0x55   : > { %p2732_p4 = pneg %p2731_p6 }
  0x56   : > { %p2026_p0 = por %p2025_p7, %p2024_p12 }
  0x57   : > { %p2019_p8 = pnand %p2017_p1, %p2732_p4 }
  0x59   : > { %p2020_p11 = pneg %p2019_p8 }
  0x5b   : > { %p2027_p3 = pnand %p2026_p0, %p2020_p11 }
  0x5d   : > { %2030 = shalt.err (!%p2027_p3)
}
  0x5e   : > { %s2733_s7 = smov 8   ;;  %s2734_s27 = smov 128  }
  0x5f   : > { %s2735_s6 = sld [smem:[#allocation28_spill]]  ;;  %s2411_s12 = scalar_lea.hbm %s2682_s0, %s2349_s14 }
  0x60   : > { %s299_s16 = scalar_lea.vmem [#allocation2], %s2352_s15  ;;  %s2418_s22 = scalar_lea.hbm %s2684_s2, %s2349_s14 }
  0x61   : > { %s306_s17 = sshll.u32 %s299_s16, 4  ;;  %s296_s18 = scalar_lea.sflag [#allocation3], %s2346_s10  ;;  %s307_s17 = int_to_ptr.vmem [resolvable:$true] %s306_s17 }
  0x62   : > { %s2031_s1 = scalar_lea.hbm %s2411_s12, 128  ;;  %s2036_s21 = scalar_lea.hbm %s2682_s0, 256 }
  0x63   : > { %p2032_p5 = scmp.ne.s32.totalorder %s2411_s12, %s2031_s1  ;;  %p2037_p1 = scmp.lt.s32.totalorder %s2411_s12, %s2682_s0 }
  0x65   : > { %1866 = dma.hbm_to_vmem [thread:$0]  (!%p2731_p6), %s2735_s6, 512, %s279_s25, [#allocation12], %s2734_s27, %s2734_s27, %s2733_s7  }
  0x66   : > { %p2034_p2 = pnand %p2032_p5, %p2374_p10  ;;  %p2038_p6 = scmp.lt.s32.totalorder %s2036_s21, %s2031_s1 }
  0x68   : > { %p2035_p13 = pneg %p2034_p2  ;;  %p2039_p4 = por %p2038_p6, %p2037_p1 }
  0x6a   : > { %p2040_p8 = pnand %p2039_p4, %p2035_p13 }
  0x6c   : > { %2043 = shalt.err (!%p2040_p8)
}
  0x6d   : > { %s2044_s14 = scalar_lea.vmem %s307_s17, 128  ;;  %s2202_s10 = smov [#allocation2]  }
  0x6e   : > { %p2045_p11 = scmp.ne.s32.totalorder %s307_s17, %s2044_s14  ;;  %s2049_s16 = sshll.u32 %s2202_s10, 4  ;;  %s2050_s16 = int_to_ptr.vmem [resolvable:$false] %s2049_s16 }
  0x6f   : > { %s2051_s20 = scalar_lea.vmem %s2050_s16, 256  ;;  %p2052_p0 = scmp.lt.s32.totalorder %s307_s17, %s2050_s16 }
  0x70   : > { %p2047_p12 = pnand %p2045_p11, %p2374_p10  ;;  %p2053_p3 = scmp.lt.s32.totalorder %s2051_s20, %s2044_s14 }
  0x72   : > { %p2048_p7 = pneg %p2047_p12  ;;  %p2054_p5 = por %p2053_p3, %p2052_p0 }
  0x74   : > { %p2055_p2 = pnand %p2054_p5, %p2048_p7 }
  0x76   : > { %2058 = shalt.err (!%p2055_p2)
}
  0x77   : > { %1870 = dma.hbm_to_vmem [thread:$0]  (!%p2354_p9), %s2411_s12, 128, %s307_s17, %s296_s18  }
  0x78   : > { %s335_s1 = scalar_lea.vmem [#allocation7], %s2352_s15  ;;  %s1721_s26 = sshll.u32 %s2195_s30, 9 }
  0x79   : > { %s342_s6 = sshll.u32 %s335_s1, 4  ;;  %s2442_s24 = scalar_lea.hbm %s2685_s3, %s1721_s26  ;;  %s343_s6 = int_to_ptr.vmem [resolvable:$true] %s342_s6 }
  0x7a   : > { %s2059_s21 = scalar_lea.hbm %s2418_s22, 128  ;;  %s2064_s16 = scalar_lea.hbm %s2684_s2, 256 }
  0x7b   : > { %p2060_p13 = scmp.ne.s32.totalorder %s2418_s22, %s2059_s21  ;;  %p2065_p4 = scmp.lt.s32.totalorder %s2418_s22, %s2684_s2 }
  0x7c   : > { %p2066_p8 = scmp.lt.s32.totalorder %s2064_s16, %s2059_s21 }
  0x7d   : > { %p2062_p1 = pnand %p2060_p13, %p2374_p10 }
  0x7e   : > { %p2067_p11 = por %p2066_p8, %p2065_p4 }
  0x7f   : > { %p2063_p6 = pneg %p2062_p1 }
  0x81   : > { %p2068_p12 = pnand %p2067_p11, %p2063_p6 }
  0x83   : > { %2071 = shalt.err (!%p2068_p12)
}
  0x84   : > { %s2072_s15 = scalar_lea.vmem %s343_s6, 128  ;;  %s2203_s17 = smov [#allocation7]  }
  0x85   : > { %p2073_p7 = scmp.ne.s32.totalorder %s343_s6, %s2072_s15  ;;  %s2077_s18 = sshll.u32 %s2203_s17, 4  ;;  %s2078_s18 = int_to_ptr.vmem [resolvable:$false] %s2077_s18 }
  0x86   : > { %s2079_s1 = scalar_lea.vmem %s2078_s18, 256  ;;  %p2080_p5 = scmp.lt.s32.totalorder %s343_s6, %s2078_s18 }
  0x87   : > { %p2075_p0 = pnand %p2073_p7, %p2374_p10  ;;  %p2081_p2 = scmp.lt.s32.totalorder %s2079_s1, %s2072_s15 }
  0x89   : > { %p2076_p3 = pneg %p2075_p0  ;;  %p2082_p13 = por %p2081_p2, %p2080_p5 }
  0x8b   : > { %p2083_p1 = pnand %p2082_p13, %p2076_p3 }
  0x8d   : > { %2086 = shalt.err (!%p2083_p1)
}
  0x8e   : > { %1876 = dma.hbm_to_vmem [thread:$0]  (!%p2354_p9), %s2418_s22, 128, %s343_s6, %s2368_s4  }
  0x8f   : > { %s2736_s26 = sand.u32 1, %s2195_s30   ;;  %s2087_s25 = scalar_lea.hbm %s2442_s24, 512 }
  0x90   : > { %s350_s8 = scalar_lea.sflag [#allocation9], %s2736_s26  ;;  %p2088_p6 = scmp.ne.s32.totalorder %s2442_s24, %s2087_s25 }
  0x91   : > { %s2092_s10 = scalar_lea.hbm %s2685_s3, 1024  ;;  %p2093_p11 = scmp.lt.s32.totalorder %s2442_s24, %s2685_s3 }
  0x92   : > { %p2090_p4 = pnand %p2088_p6, %p2374_p10  ;;  %p2094_p12 = scmp.lt.s32.totalorder %s2092_s10, %s2087_s25 }
  0x94   : > { %p2091_p8 = pneg %p2090_p4  ;;  %p2095_p7 = por %p2094_p12, %p2093_p11 }
  0x96   : > { %p2096_p0 = pnand %p2095_p7, %p2091_p8 }
  0x98   : > { %2099 = shalt.err (!%p2096_p0)
}
  0x99   : > { %s2100_s4 = scalar_lea.vmem %s2394_s23, 512  ;;  %s2204_s22 = smov [#allocation8]  }
  0x9a   : > { %p2101_p3 = scmp.ne.s32.totalorder %s2394_s23, %s2100_s4  ;;  %s2105_s6 = sshll.u32 %s2204_s22, 4  ;;  %s2106_s6 = int_to_ptr.vmem [resolvable:$false] %s2105_s6 }
  0x9b   : > { %s2107_s12 = scalar_lea.vmem %s2106_s6, 1024  ;;  %p2108_p13 = scmp.lt.s32.totalorder %s2394_s23, %s2106_s6 }
  0x9c   : > { %p2103_p5 = pnand %p2101_p3, %p2374_p10  ;;  %p2109_p1 = scmp.lt.s32.totalorder %s2107_s12, %s2100_s4 }
  0x9e   : > { %p2104_p2 = pneg %p2103_p5  ;;  %p2110_p6 = por %p2109_p1, %p2108_p13 }
  0xa0   : > { %p2111_p4 = pnand %p2110_p6, %p2104_p2 }
  0xa2   : > { %2114 = shalt.err (!%p2111_p4)
}
  0xa3   : > { %1879 = dma.hbm_to_vmem [thread:$0]  (!%p2354_p9), %s2442_s24, 512, %s2394_s23, %s350_s8, %s2734_s27, %s2734_s27, %s2733_s7  }
  0xa4   : > { %p2737_p10 = scmp.ne.s32.totalorder %s2721_s13, 0 }
  0xa5   : > { %s2489_s29 = sand.u32 (!%p2737_p10), 1, %s2187_s28   ;;  %p2738_p8 = scmp.ne.s32.totalorder (!%p2737_p10), %s2718_s11, 0 }
  0xa6   : > { %372 = sbr.rel (%p2737_p10) target bundleno = 1953 (0x7a1), region = 52  ;;  %s2492_s15 = sshll.u32 (!%p2737_p10), %s2489_s29, 3 }
  0xa7   : > { %s375_s17 = scalar_lea.sflag (!%p2737_p10), [#allocation3], %s2489_s29  ;;  %s378_s19 = scalar_lea.vmem (!%p2737_p10), [#allocation2], %s2492_s15 }
  0xab   : > { %2158 = dma.done.wait (%p2738_p8), %s375_s17, 128  }
  0xac   : > { %2160 = vsyncadd (%p2738_p8), %s375_s17, 4294967168  ;;  %s383_s13 = sand.u32 1, %s2281_s9   ;;  %s387_s7 = scalar_lea.vmem [#allocation5], %s2492_s15 }
  0xad   : > { %s384_s23 = scalar_lea.sflag [#allocation6], %s383_s13 }
  0xae   : > { %2162 = dma.done.wait (%p2738_p8), %s384_s23, 256  }
  0xaf   : > { %2164 = vsyncadd (%p2738_p8), %s384_s23, 4294967040  ;;  %s1691_s27 = sshll.u32 %s2489_s29, 5  ;;  %s396_s24 = scalar_lea.vmem [#allocation7], %s2492_s15 }
  0xb0   : > { %s402_s18 = scalar_lea.sflag [#allocation9], %s383_s13  ;;  %s2508_s1 = scalar_lea.vmem [#allocation8], %s1691_s27 }
  0xb1   : > { %2166 = dma.done.wait (%p2738_p8), %s402_s18, 512  }
  0xb2   : > { %2168 = vsyncadd (%p2738_p8), %s402_s18, 4294966784  ;;  %p2739_p9 = scmp.eq.s32.totalorder %s2281_s9, 0 }
  0xb4   : > { %2170 = dma.done.wait (%p2739_p9), [#allocation9], 1536   ;;  %p2740_p11 = pmov %p2739_p9 }
  0xb5   : > { %p2741_p12 = pmov %p2739_p9 }
  0xb6   : > { %2172 = vsyncadd (%p2740_p11), [#allocation9], 4294965760 }
  0xb7   : > { %2174 = dma.done.wait (%p2741_p12), [#allocation12], 512   ;;  %p2742_p7 = pmov %p2739_p9 }
  0xb8   : > { %v2205_v0 = vmov 0.0   ;;  %vm2206_vm0 = vmmov 0   ;;  %v552_v1 = vld [vmem:[#allocation10 + $0x38] sm:$0xff]  ;;  %v551_v3 = vld [vmem:[#allocation10 + $0x30] sm:$0xff]  ;;  %v550_v5 = vld [vmem:[#allocation10 + $0x28] sm:$0xff]  ;;  %vm473_vm1 = vcmask 261120  }
  0xb9   : > { %2176 = vsyncadd (%p2742_p7), [#allocation12], 4294966784  ;;  %1769 = vmatprep.subr.mxu1 %v2205_v0  ;;  %1758 = vmatprep.subr.mxu0 %v2205_v0  ;;  %v465_v2 = vld [vmem:[#allocation10 + $0x18] sm:$0xff]  ;;  %v464_v4 = vld [vmem:[#allocation10 + $0x10] sm:$0xff]  ;;  %vm725_vm2 = vcmask 64512   ;;  %s2207_s21 = smov 120  }
  0xba   : > { %1777 = vmatprep.mubr.msk.f32.mxu1 %vm2206_vm0, %v2205_v0  ;;  %1766 = vmatprep.mubr.msk.f32.mxu0 %vm2206_vm0, %v2205_v0  ;;  %v463_v6 = vld [vmem:[#allocation10 + $0x8] sm:$0xff]  ;;  %v549_v7 = vld [vmem:[#allocation10 + $0x20] sm:$0xff]  ;;  %v461_v10 = vld [vmem:[%s378_s19] sm:$0xff]  ;;  %s2208_s14 = smov 112   ;;  %s2209_s10 = smov 104   ;;  %vm2210_vm4 = vmmov 1  }
  0xbb   : > { %1770 = vmatpush3.msra.mxu1 %v552_v1  ;;  %1759 = vmatpush3.msra.mxu0 %v465_v2  ;;  %v462_v8 = vld [vmem:[#allocation10] sm:$0xff]  ;;  %v1698_v11 = vld [vmem:[%s2687_s5 + $0x1] ss:$0 sm:$0xff]  ;;  %v1695_v12 = vld [vmem:[%s2687_s5] ss:$0 sm:$0xff]  ;;  %s2211_s4 = smov 8  }
  0xbc   : > { %1771 = vmatprep.subr.mxu1 %v2205_v0  ;;  %1760 = vmatprep.subr.mxu0 %v2205_v0  ;;  %v547_v9 = vld [vmem:[%s387_s7] sm:$0xff]  ;;  %v639_v19 = vld [vmem:[#allocation10 + $0x58] sm:$0xff]  ;;  %v638_v20 = vld [vmem:[#allocation10 + $0x50] sm:$0xff]  ;;  %s2212_s22 = smov 16   ;;  %s2213_s6 = smov 24  }
  0xbd   : > { %1772 = vmatpush3.msra.mxu1 %v551_v3  ;;  %1761 = vmatpush3.msra.mxu0 %v464_v4  ;;  %v637_v21 = vld [vmem:[#allocation10 + $0x48] sm:$0xff]  ;;  %v636_v22 = vld [vmem:[#allocation10 + $0x40] sm:$0xff]  ;;  %v634_v23 = vld [vmem:[%s396_s24] sm:$0xff]  ;;  %s2743_s12 = sld [smem:[#allocation25_spill]]  ;;  %s1718_s23 = sshll.u32 %s2281_s9, 7 }
  0xbe   : > { %1773 = vmatprep.subr.mxu1 %v2205_v0  ;;  %1762 = vmatprep.subr.mxu0 %v2205_v0  ;;  %v721_v24 = vld [vmem:[%s2508_s1] sm:$0xff]  ;;  %v1701_v35 = vld [vmem:[%s2687_s5 + $0x2] ss:$0 sm:$0xff]  ;;  %v722_v58 = vld [vmem:[%s2508_s1 + $0x8] sm:$0xff]  ;;  %s2744_s13 = sld [smem:[#allocation29_spill]]  ;;  %s460_s7 = scalar_lea.vmem [#allocation13], %s2492_s15 }
  0xbf   : > { %1774 = vmatpush3.msra.mxu1 %v550_v5  ;;  %1763 = vmatpush3.msra.mxu0 %v463_v6  ;;  %v723_v49 = vld [vmem:[%s2508_s1 + $0x10] sm:$0xff]  ;;  %v724_v59 = vld [vmem:[%s2508_s1 + $0x18] sm:$0xff]  ;;  %s1518_s27 = sshll.u32 %s460_s7, 4  ;;  %s2745_s1 = sld [smem:[#allocation30_spill]]  ;;  %s1519_s27 = int_to_ptr.vmem [resolvable:$true] %s1518_s27 }
  0xc0   : > { %1775 = vmatprep.subr.mxu1 %v2205_v0  ;;  %1764 = vmatprep.subr.mxu0 %v2205_v0  ;;  %s1505_s26 = scalar_lea.sflag [#allocation4], %s2489_s29  ;;  %s2115_s8 = scalar_lea.vmem %s1519_s27, 128 }
  0xc1   : > { %1776 = vmatpush3.msra.mxu1 %v549_v7  ;;  %1765 = vmatpush3.msra.mxu0 %v462_v8  ;;  %p2116_p0 = scmp.ne.s32.totalorder %s1519_s27, %s2115_s8  ;;  %s2214_s9 = smov [#allocation13]  }
  0xc2   : > { %1778 = vmatmul.mubr.msk.f32.vlgmr.msra.gmra.mxu1 %vm473_vm1, %v547_v9  ;;  %1767 = vmatmul.mubr.msk.f32.vlgmr.msra.gmra.mxu0 %vm473_vm1, %v461_v10  ;;  %s2119_s15 = sshll.u32 %s2214_s9, 4  ;;  %s2120_s15 = int_to_ptr.vmem [resolvable:$false] %s2119_s15 }
  0xc3   : > { %1791 = vmatprep.subr.mxu1 %v2205_v0  ;;  %1793 = vmatprep.mubr.msk.f32.mxu1 %vm2206_vm0, %v2205_v0  ;;  %p2746_p3 = scmp.ne.s32.totalorder %s2743_s12, 0  ;;  %s2121_s25 = scalar_lea.vmem %s2120_s15, 256 }
  0xc4   : > { %1780 = vmatprep.subr.mxu0 %v2205_v0  ;;  %1788 = vmatprep.mubr.msk.f32.mxu0 %vm2206_vm0, %v2205_v0  ;;  %p2122_p13 = scmp.lt.s32.totalorder %s1519_s27, %s2120_s15  ;;  %p2123_p1 = scmp.lt.s32.totalorder %s2121_s25, %s2115_s8 }
  0xc5   : > { %1781 = vmatpush3.msra.mxu0 %v639_v19  ;;  %s2644_s11 = scalar_lea.hbm %s2745_s1, %s1718_s23  ;;  %p2117_p5 = pnand %p2116_p0, %p2746_p3 }
  0xc6   : > { %1782 = vmatprep.subr.mxu0 %v2205_v0  ;;  %p2124_p6 = por %p2123_p1, %p2122_p13 }
  0xc7   : > { %1783 = vmatpush3.msra.mxu0 %v638_v20  ;;  %p2118_p2 = pneg %p2117_p5 }
  0xc8   : > { %1784 = vmatprep.subr.mxu0 %v2205_v0 }
  0xc9   : > { %1785 = vmatpush3.msra.mxu0 %v637_v21  ;;  %p2125_p4 = pnand %p2124_p6, %p2118_p2 }
  0xca   : > { %1786 = vmatprep.subr.mxu0 %v2205_v0 }
  0xcb   : > { %1787 = vmatpush3.msra.mxu0 %v636_v22 }
  0xcc   : > { %1789 = vmatmul.mubr.msk.f32.vlgmr.msra.gmra.mxu0 %vm473_vm1, %v634_v23  ;;  %1811 = vmatprep.subr.mxu0 %v2205_v0 }
  0xcd   : > { %1813 = vmatprep.mubr.msk.f32.mxu0 %vm2206_vm0, %v2205_v0 }
 0x182   : > { %v630_v13 = vpop.f32.mrf.mxu1  ;;  %v543_v14 = vpop.f32.mrf.mxu0 }
 0x183   : > { %v631_v15 = vadd.f32 %v1698_v11, %v630_v13  ;;  %v544_v16 = vadd.f32 %v1695_v12, %v543_v14 }
 0x184   : > { %v1779_v17 = vpop.f32.mrf.mxu1  ;;  %v1768_v18 = vpop.f32.mrf.mxu0 }
 0x185   : > { %893 = vrot.lane.b32.xlu1 %v631_v15, %s2207_s21  ;;  %1792 = vmatpush3.xpose.msk.msra.mxu1 %vm725_vm2, %v631_v15 }
 0x186   : > { %1796 = vmatprep.subr.mxu1 %v2205_v0 }
 0x188   : > { %1794 = vmatmul.mubr.msk.f32.vlgmr.msra.gmra.mxu1 %vm725_vm2, %v544_v16 }
 0x189   : > { %891 = vrot.lane.b32.xlu1 %v544_v16, %s2207_s21  ;;  %1798 = vmatprep.mubr.msk.f32.mxu1 %vm2206_vm0, %v2205_v0 }
 0x18c   : > { %v717_v36 = vpop.f32.mrf.mxu0 }
 0x18d   : > { %1062 = vrot.lane.b32.xlu1 %v544_v16, %s2208_s14  ;;  %v2578_v37 = vadd.f32 %v1701_v35, %v717_v36  ;;  %v1422_v36 = vld [vmem:[#allocation11 + $0x18] sm:$0xff] }
 0x18e   : > { %v1790_v38 = vpop.f32.mrf.mxu0 }
 0x18f   : > { %1797 = vmatpush3.msra.mxu1 %v2578_v37  ;;  %v1420_v38 = vld [vmem:[#allocation11 + $0x8] sm:$0xff] }
 0x190   : > { %1801 = vmatprep.subr.mxu1 %v2205_v0 }
 0x191   : > { %1234 = vrot.lane.b32.xlu1 %v631_v15, %s2209_s10 }
 0x195   : > { %1232 = vrot.lane.b32.xlu1 %v544_v16, %s2209_s10 }
 0x1f7   : > { %v894_v39 = vpop.permute.xlu1 %893 }
 0x1fb   : > { %v892_v40 = vpop.permute.xlu1 %891 }
 0x1ff   : > { %v1063_v41 = vpop.permute.xlu1 %1062 }
 0x203   : > { %v1235_v45 = vpop.permute.xlu1 %1234 }
 0x207   : > { %v1233_v46 = vpop.permute.xlu1 %1232 }
 0x248   : > { %v798_v25 = vpop.f32.mrf.mxu1 }
 0x249   : > { %v799_v26 = vadd.f32 %v798_v25, %v721_v24 }
 0x24a   : > { %v1795_v27 = vpop.f32.mrf.mxu1 }
 0x24b   : > { %v802_v28 = vsel %vm725_vm2, %v799_v26, -inf }
 0x24c   : > { %803 = vmax.xlane.f32.xlu0 %v802_v28 }
 0x2d5   : > { %v804_v29 = vpop.xlane.xlu0 %803 }
 0x2d6   : > { %vm805_vm3 = vweird.f32 %v804_v29 }
 0x2d7   : > { %vm806_vm5 = vmxor %vm805_vm3, %vm2210_vm4  ;;  %vm1417_vm3 = vcmask 195584  }
 0x2d8   : > { %v807_v30 = vsel %vm806_vm5, %v804_v29, 0.0 }
 0x2d9   : > { %v808_v31 = vsub.f32 %v799_v26, %v807_v30 }
 0x2db   : > { %v809_v32 = vmul.f32 1.442695, %v808_v31 }
 0x2dd   : > { %1935 = vpow2.f32 %v809_v32 }
 0x2ea   : > { %v1936_v33 = vpop.eup %1935 }
 0x2eb   : > { %v811_v34 = vsel %vm725_vm2, %v1936_v33, 0.0 }
 0x2ec   : > { %812 = vadd.xlane.f32.xlu0 %v811_v34 }
 0x302   : > { %1064 = vrot.lane.b32.xlu0 %v631_v15, %s2208_s14 }
 0x375   : > { %v813_v42 = vpop.xlane.xlu0 %812 }
 0x376   : > { %vm814_vm6 = vcmp.eq.f32.partialorder %v813_v42, 0.0 }
 0x377   : > { %v815_v43 = vsel %vm814_vm6, 1.0, %v813_v42 }
 0x378   : > { %1937 = vrcp.f32 %v815_v43 }
 0x379   : > { %v1065_v44 = vpop.permute.xlu0 %1064 }
 0x37a   : > { %1812 = vmatpush3.xpose.msk.msra.mxu0 %vm725_vm2, %v1065_v44 }
 0x37b   : > { %1821 = vmatprep.subr.mxu0 %v2205_v0 }
 0x37d   : > { %1814 = vmatmul.mubr.msk.f32.vlgmr.msra.gmra.mxu0 %vm725_vm2, %v1063_v41 }
 0x37e   : > { %1822 = vmatpush3.xpose.msk.msra.mxu0 %vm725_vm2, %v1235_v45  ;;  %1823 = vmatprep.mubr.msk.f32.mxu0 %vm2206_vm0, %v2205_v0 }
 0x37f   : > { %1831 = vmatprep.subr.mxu0 %v2205_v0 }
 0x381   : > { %1824 = vmatmul.mubr.msk.f32.vlgmr.msra.gmra.mxu0 %vm725_vm2, %v1233_v46 }
 0x382   : > { %1839 = vmatprep.mubr.msk.f32.mxu0 %vm2206_vm0, %v2205_v0  ;;  %1832 = vmatpush3.msra.mxu0 %v1422_v36 }
 0x383   : > { %1833 = vmatprep.subr.mxu0 %v2205_v0 }
 0x385   : > { %v1938_v47 = vpop.eup %1937 }
 0x386   : > { %v817_v48 = vmul.f32 %v1938_v47, %v1936_v33 }
 0x388   : > { %1799 = vmatmul.mubr.msk.f32.vlgmr.msra.gmra.mxu1 %vm725_vm2, %v817_v48 }
 0x389   : > { %1802 = vmatpush3.xpose.msk.msra.mxu1 %vm725_vm2, %v894_v39  ;;  %1803 = vmatprep.mubr.msk.f32.mxu1 %vm2206_vm0, %v2205_v0  ;;  %v1419_v39 = vld [vmem:[#allocation11] sm:$0xff] }
 0x38a   : > { %1806 = vmatprep.subr.mxu1 %v2205_v0 }
 0x38c   : > { %1804 = vmatmul.mubr.msk.f32.vlgmr.msra.gmra.mxu1 %vm725_vm2, %v892_v40 }
 0x38d   : > { %1808 = vmatprep.mubr.msk.f32.mxu1 %vm2206_vm0, %v2205_v0 }
 0x43d   : > { %v1136_v50 = vpop.f32.mrf.mxu0 }
 0x43e   : > { %v1137_v51 = vadd.f32 %v1136_v50, %v723_v49 }
 0x43f   : > { %v1815_v52 = vpop.f32.mrf.mxu0 }
 0x440   : > { %v1140_v53 = vsel %vm725_vm2, %v1137_v51, -inf }
 0x441   : > { %1141 = vmax.xlane.f32.xlu0 %v1140_v53  ;;  %v1306_v54 = vpop.f32.mrf.mxu0 }
 0x442   : > { %v1307_v63 = vadd.f32 %v1306_v54, %v724_v59 }
 0x443   : > { %v1825_v55 = vpop.f32.mrf.mxu0 }
 0x444   : > { %v1310_v2 = vsel %vm725_vm2, %v1307_v63, -inf }
 0x448   : > { %v2603_v56 = vpop.f32.mrf.mxu1 }
 0x44a   : > { %v1800_v57 = vpop.f32.mrf.mxu1 }
 0x44c   : > { %v965_v60 = vpop.f32.mrf.mxu1 }
 0x44d   : > { %v966_v61 = vadd.f32 %v965_v60, %v722_v58 }
 0x44e   : > { %v1805_v62 = vpop.f32.mrf.mxu1 }
 0x44f   : > { %v969_v1 = vsel %vm725_vm2, %v966_v61, -inf }
 0x450   : > { %970 = vmax.xlane.f32.xlu1 %v969_v1 }
 0x454   : > { %1311 = vmax.xlane.f32.xlu1 %v1310_v2 }
 0x4ca   : > { %v1142_v3 = vpop.xlane.xlu0 %1141 }
 0x4cb   : > { %vm1143_vm7 = vweird.f32 %v1142_v3 }
 0x4cc   : > { %vm1144_vm8 = vmxor %vm1143_vm7, %vm2210_vm4 }
 0x4cd   : > { %v1145_v4 = vsel %vm1144_vm8, %v1142_v3, 0.0 }
 0x4ce   : > { %v1146_v5 = vsub.f32 %v1137_v51, %v1145_v4  ;;  %v1715_v51 = vld [vmem:[%s2744_s13] ss:$0 sm:$0xff] }
 0x4d0   : > { %v1147_v6 = vmul.f32 1.442695, %v1146_v5 }
 0x4d2   : > { %1939 = vpow2.f32 %v1147_v6 }
 0x4d9   : > { %v971_v7 = vpop.xlane.xlu1 %970 }
 0x4da   : > { %vm972_vm9 = vweird.f32 %v971_v7 }
 0x4db   : > { %vm973_vm10 = vmxor %vm972_vm9, %vm2210_vm4 }
 0x4dc   : > { %v974_v8 = vsel %vm973_vm10, %v971_v7, 0.0 }
 0x4dd   : > { %v1312_v9 = vpop.xlane.xlu1 %1311  ;;  %v975_v11 = vsub.f32 %v966_v61, %v974_v8 }
 0x4de   : > { %vm1313_vm11 = vweird.f32 %v1312_v9 }
 0x4df   : > { %v1940_v10 = vpop.eup %1939  ;;  %vm1314_vm12 = vmxor %vm1313_vm11, %vm2210_vm4  ;;  %v976_v15 = vmul.f32 1.442695, %v975_v11 }
 0x4e0   : > { %v1315_v12 = vsel %vm1314_vm12, %v1312_v9, 0.0  ;;  %v1149_v13 = vsel %vm725_vm2, %v1940_v10, 0.0 }
 0x4e1   : > { %v1316_v14 = vsub.f32 %v1307_v63, %v1315_v12  ;;  %1150 = vadd.xlane.f32.xlu0 %v1149_v13 }
 0x4e3   : > { %v1317_v16 = vmul.f32 1.442695, %v1316_v14 }
 0x4e5   : > { %1941 = vpow2.f32 %v1317_v16 }
 0x4e6   : > { %1943 = vpow2.f32 %v976_v15 }
 0x4f2   : > { %v1942_v17 = vpop.eup %1941 }
 0x4f3   : > { %v1319_v18 = vsel %vm725_vm2, %v1942_v17, 0.0  ;;  %v1944_v19 = vpop.eup %1943 }
 0x4f4   : > { %1320 = vadd.xlane.f32.xlu1 %v1319_v18  ;;  %v978_v20 = vsel %vm725_vm2, %v1944_v19, 0.0 }
 0x4f7   : > { %986 = vrot.lane.b32.xlu0 %v2578_v37, %s2207_s21 }
 0x4f8   : > { %979 = vadd.xlane.f32.xlu1 %v978_v20 }
 0x509   : > { %1156 = vrot.lane.b32.xlu1 %v2578_v37, %s2208_s14 }
 0x50d   : > { %1326 = vrot.lane.b32.xlu1 %v2578_v37, %s2209_s10  ;;  %v1421_v37 = vld [vmem:[#allocation11 + $0x10] sm:$0xff] }
 0x50e   : > { %1834 = vmatpush3.msra.mxu0 %v1421_v37 }
 0x50f   : > { %1835 = vmatprep.subr.mxu0 %v2205_v0 }
 0x510   : > { %1836 = vmatpush3.msra.mxu0 %v1420_v38 }
 0x511   : > { %1837 = vmatprep.subr.mxu0 %v2205_v0 }
 0x512   : > { %1838 = vmatpush3.msra.mxu0 %v1419_v39 }
 0x56a   : > { %v1151_v21 = vpop.xlane.xlu0 %1150 }
 0x56b   : > { %vm1152_vm13 = vcmp.eq.f32.partialorder %v1151_v21, 0.0 }
 0x56c   : > { %v1153_v25 = vsel %vm1152_vm13, 1.0, %v1151_v21 }
 0x56e   : > { %v987_v22 = vpop.permute.xlu0 %986 }
 0x56f   : > { %1807 = vmatpush3.msra.mxu1 %v987_v22 }
 0x570   : > { %1816 = vmatprep.subr.mxu1 %v2205_v0 }
 0x57d   : > { %v1321_v23 = vpop.xlane.xlu1 %1320 }
 0x57e   : > { %vm1322_vm15 = vcmp.eq.f32.partialorder %v1321_v23, 0.0 }
 0x57f   : > { %v1323_v27 = vsel %vm1322_vm15, 1.0, %v1321_v23 }
 0x581   : > { %v980_v24 = vpop.xlane.xlu1 %979 }
 0x582   : > { %vm981_vm14 = vcmp.eq.f32.partialorder %v980_v24, 0.0 }
 0x583   : > { %v982_v26 = vsel %vm981_vm14, 1.0, %v980_v24 }
 0x584   : > { %1945 = vrcp.f32 %v982_v26 }
 0x585   : > { %1947 = vrcp.f32 %v1153_v25  ;;  %v1157_v29 = vpop.permute.xlu1 %1156 }
 0x586   : > { %1949 = vrcp.f32 %v1323_v27 }
 0x589   : > { %v1327_v34 = vpop.permute.xlu1 %1326 }
 0x591   : > { %v1946_v28 = vpop.eup %1945 }
 0x592   : > { %v984_v30 = vmul.f32 %v1946_v28, %v1944_v19  ;;  %v1948_v31 = vpop.eup %1947 }
 0x593   : > { %v1155_v32 = vmul.f32 %v1948_v31, %v1940_v10  ;;  %v1950_v33 = vpop.eup %1949 }
 0x594   : > { %1809 = vmatmul.mubr.msk.f32.vlgmr.msra.gmra.mxu1 %vm725_vm2, %v984_v30  ;;  %v1325_v35 = vmul.f32 %v1950_v33, %v1942_v17 }
 0x595   : > { %1817 = vmatpush3.msra.mxu1 %v1157_v29  ;;  %1818 = vmatprep.mubr.msk.f32.mxu1 %vm2206_vm0, %v2205_v0 }
 0x596   : > { %1826 = vmatprep.subr.mxu1 %v2205_v0 }
 0x598   : > { %1819 = vmatmul.mubr.msk.f32.vlgmr.msra.gmra.mxu1 %vm725_vm2, %v1155_v32 }
 0x599   : > { %1827 = vmatpush3.msra.mxu1 %v1327_v34  ;;  %1828 = vmatprep.mubr.msk.f32.mxu1 %vm2206_vm0, %v2205_v0  ;;  %vm1415_vm0 = vcmask 130048  }
 0x59c   : > { %1829 = vmatmul.mubr.msk.f32.vlgmr.msra.gmra.mxu1 %vm725_vm2, %v1325_v35 }
 0x654   : > { %v1058_v40 = vpop.f32.mrf.mxu1 }
 0x655   : > { %1403 = vrot.lane.b32.xlu0 %v1058_v40, %s2211_s4 }
 0x656   : > { %v1810_v41 = vpop.f32.mrf.mxu1 }
 0x658   : > { %v1228_v42 = vpop.f32.mrf.mxu1 }
 0x659   : > { %1407 = vrot.lane.b32.xlu1 %v1228_v42, %s2212_s22 }
 0x65a   : > { %v1820_v43 = vpop.f32.mrf.mxu1 }
 0x65c   : > { %v1398_v44 = vpop.f32.mrf.mxu1 }
 0x65d   : > { %1411 = vrot.lane.b32.xlu0 %v1398_v44, %s2213_s6 }
 0x65e   : > { %v1830_v45 = vpop.f32.mrf.mxu1 }
 0x6c7   : > { %v1404_v46 = vpop.permute.xlu0 %1403 }
 0x6c8   : > { %v1414_v0 = vsel %vm725_vm2, %v2603_v56, %v1404_v46 }
 0x6cb   : > { %v1408_v47 = vpop.permute.xlu1 %1407 }
 0x6cc   : > { %v1416_v48 = vsel %vm1415_vm0, %v1414_v0, %v1408_v47 }
 0x6cf   : > { %v1412_v49 = vpop.permute.xlu0 %1411 }
 0x6d0   : > { %v1418_v50 = vsel %vm1417_vm3, %v1416_v48, %v1412_v49 }
 0x6d1   : > { %1840 = vmatmul.mubr.msk.f32.vlgmr.msra.gmra.mxu0 %vm473_vm1, %v1418_v50 }
 0x791   : > { %v1499_v52 = vpop.f32.mrf.mxu0 }
 0x792   : > { %v1500_v53 = vadd.f32 %v1715_v51, %v1499_v52 }
 0x793   : > { %v1841_v54 = vpop.f32.mrf.mxu0 }
 0x794   : > { %1503 = vst.msk [vmem:[%s460_s7] sm:$0xff] %vm473_vm1, %v1500_v53 }
 0x795   : > { %2128 = shalt.err (!%p2125_p4)
}
 0x796   : > { %s2129_s21 = scalar_lea.hbm %s2644_s11, 128  ;;  %s2133_s10 = scalar_lea.hbm %s2745_s1, 256 }
 0x797   : > { %p2130_p10 = scmp.ne.s32.totalorder %s2644_s11, %s2129_s21  ;;  %p2134_p11 = scmp.lt.s32.totalorder %s2644_s11, %s2745_s1 }
 0x798   : > { %p2135_p12 = scmp.lt.s32.totalorder %s2133_s10, %s2129_s21 }
 0x799   : > { %p2131_p8 = pnand %p2130_p10, %p2746_p3 }
 0x79a   : > { %p2136_p7 = por %p2135_p12, %p2134_p11 }
 0x79b   : > { %p2132_p9 = pneg %p2131_p8 }
 0x79d   : > { %p2137_p0 = pnand %p2136_p7, %p2132_p9 }
 0x79f   : > { %2140 = shalt.err (!%p2137_p0)
}
 0x7a0   : > { %1858 = dma.vmem_to_hbm [thread:$0]  (%p2746_p3), %s1519_s27, 128, %s2644_s11, %s1505_s26  }
 0x7a1 PF: > { %s2747_s4 = sld [smem:[#allocation20_spill]]  ;;  %p2750_p2 = scmp.ge.s32.totalorder %s2195_s30, 2 }
 0x7a2   : > { %s2748_s22 = sld [smem:[#allocation22_spill]] }
 0x7a7   : > { %s1530_s6 = sand.u32 1, %s2747_s4  }
 0x7a8   : > { %p2749_p5 = scmp.ne.s32.totalorder %s2748_s22, 0  ;;  %s1531_s17 = scalar_lea.sflag [#allocation4], %s1530_s6 }
 0x7aa   : > { %p1881_p13 = pnand %p2750_p2, %p2749_p5 }
 0x7ac   : > { %p1882_p1 = pneg %p1881_p13 }
 0x7ae   : > { %2178 = dma.done.wait (%p1882_p1), %s1531_s17, 128  }
 0x7af   : > { %2180 = vsyncadd (%p1882_p1), %s1531_s17, 4294967168  ;;  %s2751_s30 = sld [smem:[#allocation23_spill]]  ;;  %s2754_s27 = smov %s2187_s28 }
 0x7b0   : > { %s2752_s19 = sld [smem:[#allocation21_spill]] }
 0x7b1   : > { %s2753_s29 = sld [smem:[#allocation24_spill]] }
 0x7b5   : > { %p28_p6 = scmp.ge.s32.totalorder %s2751_s30, 4  }
 0x7b6   : > { %s2755_s28 = smov %s2752_s19 }
 0x7b7   :  { %30 = sbr.rel (!%p28_p6) target bundleno = 16 (0x10), region = 146 }
 0x7bc   :  { %1536 = vsyncpa [#allocation3], 1 }
 0x7bd   :  { %1538 = vsyncpa [#allocation3 + $0x1], 1 }
 0x7be   :  { %1539 = vsyncpa [#allocation6], 1 }
 0x7bf   :  { %1541 = vsyncpa [#allocation6 + $0x1], 1 }
 0x7c0   :  { %1542 = vsyncpa [#allocation9], 1 }
 0x7c1   :  { %1544 = vsyncpa [#allocation9 + $0x1], 1 }
 0x7c2   :  { %1545 = vsyncpa [#allocation12], 1 }
 0x7c3   :  { %1546 = vsyncpa [#allocation4], 1 }
 0x7c4   :  { %1548 = vsyncpa [#allocation4 + $0x1], 1 }

</bundles_post_ra>
